<compile_context>
chip_gen: v6e
topology: v6e:2x2x1
jax: 0.10.0
libtpu: 0.0.40
codegen_flags: <defaults>
</compile_context>

<pallas_src>
import numpy as np
import jax
import jax.numpy as jnp
from jax.experimental import pallas as pl
from jax.experimental.pallas import tpu as pltpu

LANE = 128
SUBLANE = 8


def _round_up(x, m):
    return (x + m - 1) // m * m


# ----------------------------- Pallas kernel --------------------------------
def _rgcn_fused_kernel(a_ref, h_ref, w_ref, b_ref, o_ref):
    """Fused multi-layer RGCN forward (single invocation, no grid).

    a_ref : (L, N, R*N)   per-layer adjacency with edge norms; relation axis
                          folded into the contraction dim (col = r*N + src)
    h_ref : (N, F)        input node features (F padded to a lane multiple)
    w_ref : (L, R, F, F)  per-layer, per-relation weights (zero padded)
    b_ref : (L, 1, F)     per-layer bias (zero padded)
    o_ref : (N, F)        output node features
    """
    n_layers = a_ref.shape[0]
    num_rels = w_ref.shape[1]

    h = h_ref[...]
    for l in range(n_layers):  # unrolled: L is small and static
        # Per-relation feature transform, stacked along the src axis so the
        # relation sum becomes part of a single contraction: (R*N, F).
        hw = jnp.concatenate(
            [jnp.dot(h, w_ref[l, r], preferred_element_type=jnp.float32)
             for r in range(num_rels)],
            axis=0)
        # sum_r A_r @ (H @ W_r) as ONE MXU pass: (N, R*N) @ (R*N, F).
        agg = jnp.dot(a_ref[l], hw, preferred_element_type=jnp.float32)
        h = jnp.tanh(agg + b_ref[l])
    o_ref[...] = h.astype(o_ref.dtype)


# ------------------------------- Wrapper -------------------------------------
def rgcn_model_forward(emb_table, weights, biases, adjs, node_ids):
    """adjs: (L, R, N, N) dense adjacency with norms; node_ids: (N,) int32."""
    n_layers, num_rels, n, _ = adjs.shape
    f_out = weights[0].shape[2]
    f_pad = _round_up(max([f_out] + [w.shape[1] for w in weights]), LANE)
    n_pad = _round_up(n, SUBLANE)

    # Embedding lookup is a gather -> JAX glue outside the kernel.
    h0 = jnp.take(emb_table, node_ids, axis=0).astype(jnp.float32)
    h0 = jnp.pad(h0, ((0, n_pad - n), (0, f_pad - h0.shape[1])))

    # Zero-pad weights/biases to a common lane-dense (f_pad, f_pad), stack over
    # layers. Padded rows/cols are zero, so results are unchanged.
    w_stk = jnp.stack([
        jnp.pad(w, ((0, 0), (0, f_pad - w.shape[1]), (0, f_pad - w.shape[2])))
        for w in weights]).astype(jnp.float32)
    b_stk = jnp.stack([
        jnp.pad(b, ((0, 0), (0, f_pad - b.shape[1]))) for b in biases
    ]).astype(jnp.float32)

    # Fold the relation axis into the contraction dim of the aggregation
    # matmul: (L, R, Nd, Ns) -> (L, Nd, R*Ns), column index = r*N + src.
    a = jnp.pad(adjs, ((0, 0), (0, 0), (0, n_pad - n), (0, n_pad - n)))
    a_cat = jnp.transpose(a, (0, 2, 1, 3)).reshape(
        n_layers, n_pad, num_rels * n_pad).astype(jnp.float32)

    vmem = lambda: pl.BlockSpec(memory_space=pltpu.MemorySpace.VMEM)
    out = pl.pallas_call(
        _rgcn_fused_kernel,
        out_shape=jax.ShapeDtypeStruct((n_pad, f_pad), jnp.float32),
        in_specs=[vmem(), vmem(), vmem(), vmem()],
        out_specs=vmem(),
    )(a_cat, h0, w_stk, b_stk)
    return out[:n, :f_out]


# ------------------------------ Model glue ----------------------------------
def xavier_uniform(key, shape, gain):
    # mirrors torch.nn.init.xavier_uniform_ fan computation
    if len(shape) == 2:
        fan_in, fan_out = shape[1], shape[0]
    else:
        receptive = int(np.prod(shape[2:]))
        fan_in = shape[1] * receptive
        fan_out = shape[0] * receptive
    limit = gain * np.sqrt(6.0 / (fan_in + fan_out))
    return jax.random.uniform(key, shape, jnp.float32, -limit, limit)


def init_params(key, in_feats, out_feats, n_nodes, n_layers, num_rels):
    gain = np.sqrt(2.0)  # calculate_gain('relu')
    keys = jax.random.split(key, 1 + 2 * n_layers)
    emb_table = jax.random.normal(keys[0], (n_nodes, in_feats), jnp.float32)
    weights, biases = [], []
    for i in range(n_layers):
        fin = in_feats if i == 0 else out_feats
        weights.append(xavier_uniform(keys[1 + 2 * i], (num_rels, fin, out_feats), gain))
        biases.append(xavier_uniform(keys[2 + 2 * i], (1, out_feats), gain))
    return emb_table, weights, biases


def rgcn_model_reference(emb_table, weights, biases, adjs, node_ids):
    h = jnp.take(emb_table, node_ids, axis=0).astype(jnp.float32)
    for i in range(len(weights)):
        out = jnp.zeros((h.shape[0], weights[i].shape[2]), jnp.float32)
        for r in range(weights[i].shape[0]):
            out = out + adjs[i][r] @ (h @ weights[i][r])
        h = jnp.tanh(out + biases[i])
    return h


# --------------------------------- Main --------------------------------------
if __name__ == "__main__":
    N = 16          # number of nodes in each graph
    IN_FEATS = 16
    OUT_FEATS = 32
    N_NODES = 64    # embedding table size
    N_LAYERS = 3
    NUM_RELS = 2

    key = jax.random.PRNGKey(0)
    k_param, k_ids, k_mask, k_norm = jax.random.split(key, 4)

    emb_table, weights, biases = init_params(
        k_param, IN_FEATS, OUT_FEATS, N_NODES, N_LAYERS, NUM_RELS)

    node_ids = jax.random.randint(k_ids, (N,), 0, N_NODES, jnp.int32)

    # per-layer, per-relation dense adjacency with edge norms baked in
    mask = jax.random.bernoulli(k_mask, 0.3, (N_LAYERS, NUM_RELS, N, N))
    norm = jax.random.uniform(k_norm, (N_LAYERS, NUM_RELS, N, N), jnp.float32)
    adjs = jnp.where(mask, norm, 0.0).astype(jnp.float32)

    out = rgcn_model_forward(emb_table, weights, biases, adjs, node_ids)
    out = jax.block_until_ready(out)

    ref = rgcn_model_reference(emb_table, weights, biases, adjs, node_ids)
    np.testing.assert_allclose(np.asarray(out), np.asarray(ref),
                               rtol=1e-4, atol=1e-4)

    print("KERNEL_OK")
</pallas_src>

<mosaic_0001>
module attributes {stable_mosaic.version = 11 : i64} {
  func.func @_rgcn_fused_kernel(%arg0: memref<3x16x32xf32, #tpu.memory_space<vmem>>, %arg1: memref<16x128xf32, #tpu.memory_space<vmem>>, %arg2: memref<3x2x128x128xf32, #tpu.memory_space<vmem>>, %arg3: memref<3x1x128xf32, #tpu.memory_space<vmem>>, %arg4: memref<16x128xf32, #tpu.memory_space<vmem>>) attributes {dimension_semantics = [], scalar_prefetch = 0 : i64, scratch_operands = 0 : i64, tpu.core_type = #tpu.core_type<tc>} {
    %c0 = arith.constant 0 : index
    %c0_0 = arith.constant 0 : index
    %0 = vector.load %arg1[%c0, %c0_0] : memref<16x128xf32, #tpu.memory_space<vmem>>, vector<16x128xf32>
    %c0_1 = arith.constant 0 : index
    %c0_2 = arith.constant 0 : index
    %c0_3 = arith.constant 0 : index
    %c0_4 = arith.constant 0 : index
    %1 = vector.load %arg2[%c0_1, %c0_2, %c0_3, %c0_4] : memref<3x2x128x128xf32, #tpu.memory_space<vmem>>, vector<1x1x128x128xf32>
    %2 = vector.shape_cast %1 : vector<1x1x128x128xf32> to vector<128x128xf32>
    %cst = arith.constant dense<0.000000e+00> : vector<16x128xf32>
    %3 = tpu.matmul %0, %2, %cst {dimension_numbers = #tpu.dot_dimension_numbers<[1], [0], [0], [1], [0, 0, 1, 1], [], []>} : vector<16x128xf32>, vector<128x128xf32>, vector<16x128xf32> -> vector<16x128xf32>
    %c0_5 = arith.constant 0 : index
    %c1 = arith.constant 1 : index
    %c0_6 = arith.constant 0 : index
    %c0_7 = arith.constant 0 : index
    %4 = vector.load %arg2[%c0_5, %c1, %c0_6, %c0_7] : memref<3x2x128x128xf32, #tpu.memory_space<vmem>>, vector<1x1x128x128xf32>
    %5 = vector.shape_cast %4 : vector<1x1x128x128xf32> to vector<128x128xf32>
    %cst_8 = arith.constant dense<0.000000e+00> : vector<16x128xf32>
    %6 = tpu.matmul %0, %5, %cst_8 {dimension_numbers = #tpu.dot_dimension_numbers<[1], [0], [0], [1], [0, 0, 1, 1], [], []>} : vector<16x128xf32>, vector<128x128xf32>, vector<16x128xf32> -> vector<16x128xf32>
    %7 = tpu.concatenate %3, %6 in 0 : vector<16x128xf32>, vector<16x128xf32> -> vector<32x128xf32>
    %c0_9 = arith.constant 0 : index
    %c0_10 = arith.constant 0 : index
    %c0_11 = arith.constant 0 : index
    %8 = vector.load %arg0[%c0_9, %c0_10, %c0_11] : memref<3x16x32xf32, #tpu.memory_space<vmem>>, vector<1x16x32xf32>
    %9 = vector.shape_cast %8 : vector<1x16x32xf32> to vector<16x32xf32>
    %cst_12 = arith.constant dense<0.000000e+00> : vector<16x128xf32>
    %10 = tpu.matmul %9, %7, %cst_12 {dimension_numbers = #tpu.dot_dimension_numbers<[1], [0], [0], [1], [0, 0, 1, 1], [], []>} : vector<16x32xf32>, vector<32x128xf32>, vector<16x128xf32> -> vector<16x128xf32>
    %c0_13 = arith.constant 0 : index
    %c0_14 = arith.constant 0 : index
    %c0_15 = arith.constant 0 : index
    %11 = vector.load %arg3[%c0_13, %c0_14, %c0_15] : memref<3x1x128xf32, #tpu.memory_space<vmem>>, vector<1x1x128xf32>
    %12 = vector.shape_cast %11 : vector<1x1x128xf32> to vector<1x128xf32>
    %13 = vector.broadcast %12 : vector<1x128xf32> to vector<16x128xf32>
    %14 = arith.addf %10, %13 : vector<16x128xf32>
    %15 = math.tanh %14 : vector<16x128xf32>
    %c1_16 = arith.constant 1 : index
    %c0_17 = arith.constant 0 : index
    %c0_18 = arith.constant 0 : index
    %c0_19 = arith.constant 0 : index
    %16 = vector.load %arg2[%c1_16, %c0_17, %c0_18, %c0_19] : memref<3x2x128x128xf32, #tpu.memory_space<vmem>>, vector<1x1x128x128xf32>
    %17 = vector.shape_cast %16 : vector<1x1x128x128xf32> to vector<128x128xf32>
    %cst_20 = arith.constant dense<0.000000e+00> : vector<16x128xf32>
    %18 = tpu.matmul %15, %17, %cst_20 {dimension_numbers = #tpu.dot_dimension_numbers<[1], [0], [0], [1], [0, 0, 1, 1], [], []>} : vector<16x128xf32>, vector<128x128xf32>, vector<16x128xf32> -> vector<16x128xf32>
    %c1_21 = arith.constant 1 : index
    %c1_22 = arith.constant 1 : index
    %c0_23 = arith.constant 0 : index
    %c0_24 = arith.constant 0 : index
    %19 = vector.load %arg2[%c1_21, %c1_22, %c0_23, %c0_24] : memref<3x2x128x128xf32, #tpu.memory_space<vmem>>, vector<1x1x128x128xf32>
    %20 = vector.shape_cast %19 : vector<1x1x128x128xf32> to vector<128x128xf32>
    %cst_25 = arith.constant dense<0.000000e+00> : vector<16x128xf32>
    %21 = tpu.matmul %15, %20, %cst_25 {dimension_numbers = #tpu.dot_dimension_numbers<[1], [0], [0], [1], [0, 0, 1, 1], [], []>} : vector<16x128xf32>, vector<128x128xf32>, vector<16x128xf32> -> vector<16x128xf32>
    %22 = tpu.concatenate %18, %21 in 0 : vector<16x128xf32>, vector<16x128xf32> -> vector<32x128xf32>
    %c1_26 = arith.constant 1 : index
    %c0_27 = arith.constant 0 : index
    %c0_28 = arith.constant 0 : index
    %23 = vector.load %arg0[%c1_26, %c0_27, %c0_28] : memref<3x16x32xf32, #tpu.memory_space<vmem>>, vector<1x16x32xf32>
    %24 = vector.shape_cast %23 : vector<1x16x32xf32> to vector<16x32xf32>
    %cst_29 = arith.constant dense<0.000000e+00> : vector<16x128xf32>
    %25 = tpu.matmul %24, %22, %cst_29 {dimension_numbers = #tpu.dot_dimension_numbers<[1], [0], [0], [1], [0, 0, 1, 1], [], []>} : vector<16x32xf32>, vector<32x128xf32>, vector<16x128xf32> -> vector<16x128xf32>
    %c1_30 = arith.constant 1 : index
    %c0_31 = arith.constant 0 : index
    %c0_32 = arith.constant 0 : index
    %26 = vector.load %arg3[%c1_30, %c0_31, %c0_32] : memref<3x1x128xf32, #tpu.memory_space<vmem>>, vector<1x1x128xf32>
    %27 = vector.shape_cast %26 : vector<1x1x128xf32> to vector<1x128xf32>
    %28 = vector.broadcast %27 : vector<1x128xf32> to vector<16x128xf32>
    %29 = arith.addf %25, %28 : vector<16x128xf32>
    %30 = math.tanh %29 : vector<16x128xf32>
    %c2 = arith.constant 2 : index
    %c0_33 = arith.constant 0 : index
    %c0_34 = arith.constant 0 : index
    %c0_35 = arith.constant 0 : index
    %31 = vector.load %arg2[%c2, %c0_33, %c0_34, %c0_35] : memref<3x2x128x128xf32, #tpu.memory_space<vmem>>, vector<1x1x128x128xf32>
    %32 = vector.shape_cast %31 : vector<1x1x128x128xf32> to vector<128x128xf32>
    %cst_36 = arith.constant dense<0.000000e+00> : vector<16x128xf32>
    %33 = tpu.matmul %30, %32, %cst_36 {dimension_numbers = #tpu.dot_dimension_numbers<[1], [0], [0], [1], [0, 0, 1, 1], [], []>} : vector<16x128xf32>, vector<128x128xf32>, vector<16x128xf32> -> vector<16x128xf32>
    %c2_37 = arith.constant 2 : index
    %c1_38 = arith.constant 1 : index
    %c0_39 = arith.constant 0 : index
    %c0_40 = arith.constant 0 : index
    %34 = vector.load %arg2[%c2_37, %c1_38, %c0_39, %c0_40] : memref<3x2x128x128xf32, #tpu.memory_space<vmem>>, vector<1x1x128x128xf32>
    %35 = vector.shape_cast %34 : vector<1x1x128x128xf32> to vector<128x128xf32>
    %cst_41 = arith.constant dense<0.000000e+00> : vector<16x128xf32>
    %36 = tpu.matmul %30, %35, %cst_41 {dimension_numbers = #tpu.dot_dimension_numbers<[1], [0], [0], [1], [0, 0, 1, 1], [], []>} : vector<16x128xf32>, vector<128x128xf32>, vector<16x128xf32> -> vector<16x128xf32>
    %37 = tpu.concatenate %33, %36 in 0 : vector<16x128xf32>, vector<16x128xf32> -> vector<32x128xf32>
    %c2_42 = arith.constant 2 : index
    %c0_43 = arith.constant 0 : index
    %c0_44 = arith.constant 0 : index
    %38 = vector.load %arg0[%c2_42, %c0_43, %c0_44] : memref<3x16x32xf32, #tpu.memory_space<vmem>>, vector<1x16x32xf32>
    %39 = vector.shape_cast %38 : vector<1x16x32xf32> to vector<16x32xf32>
    %cst_45 = arith.constant dense<0.000000e+00> : vector<16x128xf32>
    %40 = tpu.matmul %39, %37, %cst_45 {dimension_numbers = #tpu.dot_dimension_numbers<[1], [0], [0], [1], [0, 0, 1, 1], [], []>} : vector<16x32xf32>, vector<32x128xf32>, vector<16x128xf32> -> vector<16x128xf32>
    %c2_46 = arith.constant 2 : index
    %c0_47 = arith.constant 0 : index
    %c0_48 = arith.constant 0 : index
    %41 = vector.load %arg3[%c2_46, %c0_47, %c0_48] : memref<3x1x128xf32, #tpu.memory_space<vmem>>, vector<1x1x128xf32>
    %42 = vector.shape_cast %41 : vector<1x1x128xf32> to vector<1x128xf32>
    %43 = vector.broadcast %42 : vector<1x128xf32> to vector<16x128xf32>
    %44 = arith.addf %40, %43 : vector<16x128xf32>
    %45 = math.tanh %44 : vector<16x128xf32>
    %c0_49 = arith.constant 0 : index
    %c0_50 = arith.constant 0 : index
    %46 = vector.load %arg4[%c0_49, %c0_50] : memref<16x128xf32, #tpu.memory_space<vmem>>, vector<16x128xf32>
    tpu.vector_store %arg4[%c0_49, %c0_50], %45 {strides = array<i32>} : memref<16x128xf32, #tpu.memory_space<vmem>>, vector<16x128xf32>,
    return
  }
}

</mosaic_0001>

<bundles_post_ra>
// kernel: tpu_custom_call.1
= control target key start
LH: loop header
LB: loop body
LE: loop exit
PB: predicated region body
PF: predicated region fallthrough
CT: control target
= control target key end

     0   :  { %9 = vsyncpa [#allocation3], 0  ;;  %s1467_s0 = inlined_call_operand.hbm [shape: f32[3,16,32], index: 0, kind: input, shape index: {}]   ;;  %s1468_s1 = inlined_call_operand.hbm [shape: f32[16,128], index: 1, kind: input, shape index: {}]   ;;  %s1469_s2 = inlined_call_operand.hbm [shape: f32[3,2,128,128], index: 2, kind: input, shape index: {}]   ;;  %s1470_s3 = inlined_call_operand.vmem [shape: f32[3,1,128], index: 3, kind: input, shape index: {}]   ;;  %s1471_s4 = inlined_call_operand.hbm [shape: f32[16,128], index: 4, kind: output, shape index: {}]  }
   0x1   :  { %10 = vsyncpa [#allocation6], 0 }
   0x2   :  { %11 = vsyncpa [#allocation4], 0  ;;  %s1397_s15 = smov [#allocation5]   ;;  %s1398_s17 = smov [#allocation2]  }
   0x3   :  { %s29_s16 = sshll.u32 %s1397_s15, 4  ;;  %s17_s18 = sshll.u32 %s1398_s17, 4  ;;  %s30_s16 = int_to_ptr.vmem [resolvable:$true] %s29_s16  ;;  %s18_s18 = int_to_ptr.vmem [resolvable:$true] %s17_s18 }
   0x4   :  { %s1319_s19 = scalar_lea.vmem %s30_s16, 256  ;;  %p1324_p1 = scmp.lt.s32.totalorder %s30_s16, %s30_s16 }
   0x5   :  { %p1320_p0 = scmp.ne.s32.totalorder %s30_s16, %s1319_s19  ;;  %p1325_p2 = scmp.lt.s32.totalorder %s1319_s19, %s1319_s19 }
   0x7   :  { %p1326_p3 = por %p1325_p2, %p1324_p1 }
   0x9   :  { %p1327_p4 = pnand %p1326_p3, %p1320_p0 }
   0xb   :  { %1330 = shalt.err (!%p1327_p4)
}
   0xc   :  { %s1399_s20 = smov 128   ;;  %s1400_s21 = smov 8  }
   0xd   :  { %35 = dma.hbm_to_vmem [thread:$0]  %s1468_s1, 256, %s30_s16, [#allocation6], %s1399_s20, %s1399_s20, %s1400_s21  }
   0xe   :  { %s1339_s24 = scalar_lea.vmem %s18_s18, 768  ;;  %p1344_p6 = scmp.lt.s32.totalorder %s18_s18, %s18_s18 }
   0xf   :  { %p1340_p5 = scmp.ne.s32.totalorder %s18_s18, %s1339_s24  ;;  %p1345_p7 = scmp.lt.s32.totalorder %s1339_s24, %s1339_s24 }
  0x11   :  { %p1346_p8 = por %p1345_p7, %p1344_p6 }
  0x13   :  { %p1347_p9 = pnand %p1346_p8, %p1340_p5 }
  0x15   :  { %1350 = shalt.err (!%p1347_p9)
}
  0x16   :  { %23 = dma.hbm_to_vmem [thread:$0]  %s1467_s0, 768, %s18_s18, [#allocation3], %s1399_s20, %s1399_s20, %s1400_s21  }
  0x17   :  { %s1401_s27 = smov [#allocation7]  }
  0x18   :  { %s41_s28 = sshll.u32 %s1401_s27, 4  ;;  %s42_s28 = int_to_ptr.vmem [resolvable:$true] %s41_s28 }
  0x19   :  { %s1359_s29 = scalar_lea.vmem %s42_s28, 12288  ;;  %p1364_p11 = scmp.lt.s32.totalorder %s42_s28, %s42_s28 }
  0x1a   :  { %p1360_p10 = scmp.ne.s32.totalorder %s42_s28, %s1359_s29  ;;  %p1365_p12 = scmp.lt.s32.totalorder %s1359_s29, %s1359_s29 }
  0x1c   :  { %p1366_p13 = por %p1365_p12, %p1364_p11 }
  0x1e   :  { %p1367_p0 = pnand %p1366_p13, %p1360_p10 }
  0x20   :  { %1370 = shalt.err (!%p1367_p0)
}
  0x21   :  { %47 = dma.hbm_to_vmem [thread:$0]  %s1469_s2, 12288, %s42_s28, [#allocation6], %s1399_s20, %s1399_s20, %s1400_s21  }
  0x22   :  { %1391 = dma.done.wait [#allocation3], 768  }
  0x23   :  { %1392 = vsyncadd [#allocation3], 4294966528 }
  0x24   :  { %1393 = dma.done.wait [#allocation6], 12544  }
  0x25   :  { %1394 = vsyncadd [#allocation6], 4294954752  ;;  %v168_v0 = vld [vmem:[#allocation7 + $0xf8] sm:$0xff]  ;;  %v167_v2 = vld [vmem:[#allocation7 + $0xf0] sm:$0xff]  ;;  %vm253_vm0 = vcmask 261120   ;;  %s1402_s9 = smov [#allocation8]  }
  0x26   :  { %v76_v1 = vld [vmem:[#allocation7 + $0x78] sm:$0xff]  ;;  %1085 = vmatprep.subr.mxu1 %v168_v0  ;;  %v75_v3 = vld [vmem:[#allocation7 + $0x70] sm:$0xff]  ;;  %v166_v4 = vld [vmem:[#allocation7 + $0xe8] sm:$0xff]  ;;  %s900_s10 = sshll.u32 %s1402_s9, 4  ;;  %s901_s10 = int_to_ptr.vmem [resolvable:$true] %s900_s10 }
  0x27   :  { %1050 = vmatprep.subr.mxu0 %v76_v1  ;;  %1086 = vmatpush3.msra.mxu1 %v168_v0  ;;  %v74_v5 = vld [vmem:[#allocation7 + $0x68] sm:$0xff]  ;;  %v165_v6 = vld [vmem:[#allocation7 + $0xe0] sm:$0xff]  ;;  %v164_v8 = vld [vmem:[#allocation7 + $0xd8] sm:$0xff]  ;;  %s1371_s11 = scalar_lea.vmem %s901_s10, 256  ;;  %p1376_p2 = scmp.lt.s32.totalorder %s901_s10, %s901_s10 }
  0x28   :  { %1051 = vmatpush3.msra.mxu0 %v76_v1  ;;  %1087 = vmatprep.subr.mxu1 %v167_v2  ;;  %v73_v7 = vld [vmem:[#allocation7 + $0x60] sm:$0xff]  ;;  %v72_v9 = vld [vmem:[#allocation7 + $0x58] sm:$0xff]  ;;  %v163_v10 = vld [vmem:[#allocation7 + $0xd0] sm:$0xff]  ;;  %p1372_p1 = scmp.ne.s32.totalorder %s901_s10, %s1371_s11  ;;  %p1377_p3 = scmp.lt.s32.totalorder %s1371_s11, %s1371_s11 }
  0x29   :  { %1052 = vmatprep.subr.mxu0 %v75_v3  ;;  %1088 = vmatpush3.msra.mxu1 %v167_v2  ;;  %v71_v11 = vld [vmem:[#allocation7 + $0x50] sm:$0xff]  ;;  %v162_v12 = vld [vmem:[#allocation7 + $0xc8] sm:$0xff]  ;;  %v161_v14 = vld [vmem:[#allocation7 + $0xc0] sm:$0xff] }
  0x2a   :  { %1053 = vmatpush3.msra.mxu0 %v75_v3  ;;  %1089 = vmatprep.subr.mxu1 %v166_v4  ;;  %v70_v13 = vld [vmem:[#allocation7 + $0x48] sm:$0xff]  ;;  %v69_v15 = vld [vmem:[#allocation7 + $0x40] sm:$0xff]  ;;  %v160_v16 = vld [vmem:[#allocation7 + $0xb8] sm:$0xff]  ;;  %p1378_p4 = por %p1377_p3, %p1376_p2 }
  0x2b   :  { %1054 = vmatprep.subr.mxu0 %v74_v5  ;;  %1090 = vmatpush3.msra.mxu1 %v166_v4  ;;  %v68_v17 = vld [vmem:[#allocation7 + $0x38] sm:$0xff]  ;;  %v159_v18 = vld [vmem:[#allocation7 + $0xb0] sm:$0xff]  ;;  %v158_v20 = vld [vmem:[#allocation7 + $0xa8] sm:$0xff] }
  0x2c   :  { %1055 = vmatpush3.msra.mxu0 %v74_v5  ;;  %1091 = vmatprep.subr.mxu1 %v165_v6  ;;  %v67_v19 = vld [vmem:[#allocation7 + $0x30] sm:$0xff]  ;;  %v66_v21 = vld [vmem:[#allocation7 + $0x28] sm:$0xff]  ;;  %v157_v22 = vld [vmem:[#allocation7 + $0xa0] sm:$0xff]  ;;  %p1379_p5 = pnand %p1378_p4, %p1372_p1 }
  0x2d   :  { %1056 = vmatprep.subr.mxu0 %v73_v7  ;;  %1092 = vmatpush3.msra.mxu1 %v165_v6  ;;  %v65_v23 = vld [vmem:[#allocation7 + $0x20] sm:$0xff]  ;;  %v156_v24 = vld [vmem:[#allocation7 + $0x98] sm:$0xff]  ;;  %v155_v26 = vld [vmem:[#allocation7 + $0x90] sm:$0xff] }
  0x2e   :  { %1057 = vmatpush3.msra.mxu0 %v73_v7  ;;  %1093 = vmatprep.subr.mxu1 %v164_v8  ;;  %v64_v25 = vld [vmem:[#allocation7 + $0x18] sm:$0xff]  ;;  %v63_v27 = vld [vmem:[#allocation7 + $0x10] sm:$0xff]  ;;  %v154_v28 = vld [vmem:[#allocation7 + $0x88] sm:$0xff] }
  0x2f   :  { %1058 = vmatprep.subr.mxu0 %v72_v9  ;;  %1094 = vmatpush3.msra.mxu1 %v164_v8  ;;  %v62_v29 = vld [vmem:[#allocation7 + $0x8] sm:$0xff]  ;;  %v153_v30 = vld [vmem:[#allocation7 + $0x80] sm:$0xff]  ;;  %v59_v31 = vld [vmem:[#allocation5] sm:$0xff] }
  0x30   :  { %1059 = vmatpush3.msra.mxu0 %v72_v9  ;;  %1095 = vmatprep.subr.mxu1 %v163_v10  ;;  %v61_v32 = vld [vmem:[#allocation7] sm:$0xff]  ;;  %v60_v33 = vld [vmem:[#allocation5 + $0x8] sm:$0xff]  ;;  %v352_v36 = vld [vmem:[#allocation7 + $0x170] sm:$0xff] }
  0x31   :  { %1060 = vmatprep.subr.mxu0 %v71_v11  ;;  %1096 = vmatpush3.msra.mxu1 %v163_v10  ;;  %v244_v34 = vld [vmem:[#allocation2] sm:$0xff]  ;;  %v353_v35 = vld [vmem:[#allocation7 + $0x178] sm:$0xff]  ;;  %v351_v37 = vld [vmem:[#allocation7 + $0x168] sm:$0xff] }
  0x32   :  { %1061 = vmatpush3.msra.mxu0 %v71_v11  ;;  %1097 = vmatprep.subr.mxu1 %v162_v12  ;;  %v350_v38 = vld [vmem:[#allocation7 + $0x160] sm:$0xff]  ;;  %v349_v39 = vld [vmem:[#allocation7 + $0x158] sm:$0xff]  ;;  %v348_v40 = vld [vmem:[#allocation7 + $0x150] sm:$0xff] }
  0x33   :  { %1062 = vmatprep.subr.mxu0 %v70_v13  ;;  %1098 = vmatpush3.msra.mxu1 %v162_v12  ;;  %v245_v45 = vld [vmem:[#allocation2 + $0x8] sm:$0xff]  ;;  %v445_v46 = vld [vmem:[#allocation7 + $0x1f8] sm:$0xff]  ;;  %v444_v47 = vld [vmem:[#allocation7 + $0x1f0] sm:$0xff] }
  0x34   :  { %1063 = vmatpush3.msra.mxu0 %v70_v13  ;;  %1099 = vmatprep.subr.mxu1 %v161_v14  ;;  %v443_v48 = vld [vmem:[#allocation7 + $0x1e8] sm:$0xff]  ;;  %v442_v49 = vld [vmem:[#allocation7 + $0x1e0] sm:$0xff]  ;;  %v441_v50 = vld [vmem:[#allocation7 + $0x1d8] sm:$0xff] }
  0x35   :  { %1064 = vmatprep.subr.mxu0 %v69_v15  ;;  %1100 = vmatpush3.msra.mxu1 %v161_v14  ;;  %v440_v51 = vld [vmem:[#allocation7 + $0x1d0] sm:$0xff]  ;;  %v347_v52 = vld [vmem:[#allocation7 + $0x148] sm:$0xff]  ;;  %v346_v54 = vld [vmem:[#allocation7 + $0x140] sm:$0xff] }
  0x36   :  { %1065 = vmatpush3.msra.mxu0 %v69_v15  ;;  %1101 = vmatprep.subr.mxu1 %v160_v16  ;;  %v439_v53 = vld [vmem:[#allocation7 + $0x1c8] sm:$0xff]  ;;  %v438_v55 = vld [vmem:[#allocation7 + $0x1c0] sm:$0xff]  ;;  %v345_v56 = vld [vmem:[#allocation7 + $0x138] sm:$0xff] }
  0x37   :  { %1066 = vmatprep.subr.mxu0 %v68_v17  ;;  %1102 = vmatpush3.msra.mxu1 %v160_v16  ;;  %v437_v57 = vld [vmem:[#allocation7 + $0x1b8] sm:$0xff]  ;;  %v344_v58 = vld [vmem:[#allocation7 + $0x130] sm:$0xff]  ;;  %v343_v60 = vld [vmem:[#allocation7 + $0x128] sm:$0xff] }
  0x38   :  { %1067 = vmatpush3.msra.mxu0 %v68_v17  ;;  %1103 = vmatprep.subr.mxu1 %v159_v18  ;;  %v436_v59 = vld [vmem:[#allocation7 + $0x1b0] sm:$0xff]  ;;  %v435_v61 = vld [vmem:[#allocation7 + $0x1a8] sm:$0xff]  ;;  %v342_v62 = vld [vmem:[#allocation7 + $0x120] sm:$0xff] }
  0x39   :  { %1068 = vmatprep.subr.mxu0 %v67_v19  ;;  %1104 = vmatpush3.msra.mxu1 %v159_v18  ;;  %v434_v63 = vld [vmem:[#allocation7 + $0x1a0] sm:$0xff]  ;;  %v341_v0 = vld [vmem:[#allocation7 + $0x118] sm:$0xff]  ;;  %v340_v2 = vld [vmem:[#allocation7 + $0x110] sm:$0xff] }
  0x3a   :  { %1069 = vmatpush3.msra.mxu0 %v67_v19  ;;  %1105 = vmatprep.subr.mxu1 %v158_v20  ;;  %v433_v1 = vld [vmem:[#allocation7 + $0x198] sm:$0xff]  ;;  %v432_v3 = vld [vmem:[#allocation7 + $0x190] sm:$0xff]  ;;  %v339_v4 = vld [vmem:[#allocation7 + $0x108] sm:$0xff] }
  0x3b   :  { %1070 = vmatprep.subr.mxu0 %v66_v21  ;;  %1106 = vmatpush3.msra.mxu1 %v158_v20  ;;  %v431_v5 = vld [vmem:[#allocation7 + $0x188] sm:$0xff]  ;;  %v338_v6 = vld [vmem:[#allocation7 + $0x100] sm:$0xff]  ;;  %v522_v15 = vld [vmem:[#allocation2 + $0x10] sm:$0xff] }
  0x3c   :  { %1071 = vmatpush3.msra.mxu0 %v66_v21  ;;  %1107 = vmatprep.subr.mxu1 %v157_v22  ;;  %v430_v7 = vld [vmem:[#allocation7 + $0x180] sm:$0xff]  ;;  %v631_v16 = vld [vmem:[#allocation7 + $0x278] sm:$0xff]  ;;  %v630_v17 = vld [vmem:[#allocation7 + $0x270] sm:$0xff] }
  0x3d   :  { %1072 = vmatprep.subr.mxu0 %v65_v23  ;;  %1108 = vmatpush3.msra.mxu1 %v157_v22  ;;  %v913_v8 = vld [vmem:[%s1470_s3] ss:$0 sm:$0xff]  ;;  %v629_v18 = vld [vmem:[#allocation7 + $0x268] sm:$0xff]  ;;  %v627_v20 = vld [vmem:[#allocation7 + $0x258] sm:$0xff] }
  0x3e   :  { %1073 = vmatpush3.msra.mxu0 %v65_v23  ;;  %1109 = vmatprep.subr.mxu1 %v156_v24  ;;  %v628_v19 = vld [vmem:[#allocation7 + $0x260] sm:$0xff]  ;;  %v626_v21 = vld [vmem:[#allocation7 + $0x250] sm:$0xff] }
  0x3f   :  { %1074 = vmatprep.subr.mxu0 %v64_v25  ;;  %1110 = vmatpush3.msra.mxu1 %v156_v24 }
  0x40   :  { %1075 = vmatpush3.msra.mxu0 %v64_v25  ;;  %1111 = vmatprep.subr.mxu1 %v155_v26 }
  0x41   :  { %1076 = vmatprep.subr.mxu0 %v63_v27  ;;  %1112 = vmatpush3.msra.mxu1 %v155_v26  ;;  %v523_v26 = vld [vmem:[#allocation2 + $0x18] sm:$0xff] }
  0x42   :  { %1077 = vmatpush3.msra.mxu0 %v63_v27  ;;  %1113 = vmatprep.subr.mxu1 %v154_v28  ;;  %v723_v27 = vld [vmem:[#allocation7 + $0x2f8] sm:$0xff] }
  0x43   :  { %1078 = vmatprep.subr.mxu0 %v62_v29  ;;  %1114 = vmatpush3.msra.mxu1 %v154_v28  ;;  %v722_v28 = vld [vmem:[#allocation7 + $0x2f0] sm:$0xff] }
  0x44   :  { %1079 = vmatpush3.msra.mxu0 %v62_v29  ;;  %1115 = vmatprep.subr.mxu1 %v153_v30  ;;  %v721_v29 = vld [vmem:[#allocation7 + $0x2e8] sm:$0xff] }
  0x45   :  { %1117 = vmatprep.mubr.f32.mxu1 %v59_v31  ;;  %1116 = vmatpush3.msra.mxu1 %v153_v30  ;;  %v720_v30 = vld [vmem:[#allocation7 + $0x2e0] sm:$0xff] }
  0x46   :  { %1080 = vmatprep.subr.mxu0 %v61_v32  ;;  %1118 = vmatmul.mubr.f32.vlgmr.msra.gmra.mxu1 %v60_v33 }
  0x47   :  { %1081 = vmatpush3.msra.mxu0 %v61_v32  ;;  %1082 = vmatprep.mubr.f32.mxu0 %v59_v31  ;;  %v719_v31 = vld [vmem:[#allocation7 + $0x2d8] sm:$0xff]  ;;  %v718_v32 = vld [vmem:[#allocation7 + $0x2d0] sm:$0xff] }
  0x48   :  { %1083 = vmatmul.mubr.f32.vlgmr.msra.gmra.mxu0 %v60_v33  ;;  %1131 = vmatprep.subr.mxu1 %v353_v35  ;;  %v625_v33 = vld [vmem:[#allocation7 + $0x248] sm:$0xff] }
  0x49   :  { %1128 = vmatprep.mubr.msk.f32.mxu0 %vm253_vm0, %v244_v34  ;;  %1132 = vmatpush3.msra.mxu1 %v353_v35  ;;  %v717_v34 = vld [vmem:[#allocation7 + $0x2c8] sm:$0xff]  ;;  %v624_v35 = vld [vmem:[#allocation7 + $0x240] sm:$0xff] }
  0x4a   :  { %1133 = vmatprep.subr.mxu1 %v352_v36 }
  0x4b   :  { %1134 = vmatpush3.msra.mxu1 %v352_v36  ;;  %v716_v36 = vld [vmem:[#allocation7 + $0x2c0] sm:$0xff] }
  0x4c   :  { %1135 = vmatprep.subr.mxu1 %v351_v37 }
  0x4d   :  { %1136 = vmatpush3.msra.mxu1 %v351_v37  ;;  %v623_v37 = vld [vmem:[#allocation7 + $0x238] sm:$0xff] }
  0x4e   :  { %1137 = vmatprep.subr.mxu1 %v350_v38 }
  0x4f   :  { %1138 = vmatpush3.msra.mxu1 %v350_v38  ;;  %v715_v38 = vld [vmem:[#allocation7 + $0x2b8] sm:$0xff] }
  0x50   :  { %1139 = vmatprep.subr.mxu1 %v349_v39 }
  0x51   :  { %1140 = vmatpush3.msra.mxu1 %v349_v39  ;;  %v622_v39 = vld [vmem:[#allocation7 + $0x230] sm:$0xff] }
  0x52   :  { %1141 = vmatprep.subr.mxu1 %v348_v40 }
  0x53   :  { %1142 = vmatpush3.msra.mxu1 %v348_v40  ;;  %v714_v40 = vld [vmem:[#allocation7 + $0x2b0] sm:$0xff] }
  0x54   :  { %1143 = vmatprep.subr.mxu1 %v347_v52 }
  0x55   :  { %1144 = vmatpush3.msra.mxu1 %v347_v52  ;;  %v708_v52 = vld [vmem:[#allocation7 + $0x280] sm:$0xff] }
  0x56   :  { %1145 = vmatprep.subr.mxu1 %v346_v54 }
  0x57   :  { %1146 = vmatpush3.msra.mxu1 %v346_v54 }
  0x58   :  { %1147 = vmatprep.subr.mxu1 %v345_v56 }
  0x59   :  { %1148 = vmatpush3.msra.mxu1 %v345_v56 }
  0x5a   :  { %1149 = vmatprep.subr.mxu1 %v344_v58 }
  0x5b   :  { %1150 = vmatpush3.msra.mxu1 %v344_v58 }
  0x5c   :  { %1151 = vmatprep.subr.mxu1 %v343_v60 }
  0x5d   :  { %1152 = vmatpush3.msra.mxu1 %v343_v60  ;;  %v800_v60 = vld [vmem:[#allocation2 + $0x20] sm:$0xff] }
  0x5e   :  { %1153 = vmatprep.subr.mxu1 %v342_v62 }
  0x5f   :  { %1154 = vmatpush3.msra.mxu1 %v342_v62 }
  0x60   :  { %1155 = vmatprep.subr.mxu1 %v341_v0 }
  0x61   :  { %1156 = vmatpush3.msra.mxu1 %v341_v0 }
  0x62   :  { %1157 = vmatprep.subr.mxu1 %v340_v2 }
  0x63   :  { %1158 = vmatpush3.msra.mxu1 %v340_v2  ;;  %v921_v2 = vld [vmem:[%s1470_s3 + $0x2] ss:$0 sm:$0xff] }
  0x64   :  { %1159 = vmatprep.subr.mxu1 %v339_v4 }
  0x65   :  { %1160 = vmatpush3.msra.mxu1 %v339_v4 }
  0x66   :  { %1161 = vmatprep.subr.mxu1 %v338_v6 }
  0x67   :  { %1162 = vmatpush3.msra.mxu1 %v338_v6 }
 0x106   :  { %v1119_v41 = vpop.f32.mrf.mxu1 }
 0x107   :  { %1120 = vmatprep.subr.mxu0 %v1119_v41 }
 0x108   :  { %v1084_v42 = vpop.f32.mrf.mxu0  ;;  %v235_v43 = vpop.f32.mrf.mxu1  ;;  %1121 = vmatpush3.msra.mxu0 %v1119_v41  ;;  %v621_v41 = vld [vmem:[#allocation7 + $0x228] sm:$0xff] }
 0x109   :  { %1122 = vmatprep.subr.mxu0 %v235_v43 }
 0x10a   :  { %1123 = vmatpush3.msra.mxu0 %v235_v43  ;;  %v143_v44 = vpop.f32.mrf.mxu0  ;;  %v620_v43 = vld [vmem:[#allocation7 + $0x220] sm:$0xff] }
 0x10b   :  { %1124 = vmatprep.subr.mxu0 %v1084_v42 }
 0x10c   :  { %1125 = vmatpush3.msra.mxu0 %v1084_v42  ;;  %v713_v42 = vld [vmem:[#allocation7 + $0x2a8] sm:$0xff] }
 0x10d   :  { %1126 = vmatprep.subr.mxu0 %v143_v44 }
 0x10e   :  { %1127 = vmatpush3.msra.mxu0 %v143_v44  ;;  %v712_v44 = vld [vmem:[#allocation7 + $0x2a0] sm:$0xff] }
 0x10f   :  { %1129 = vmatmul.mubr.msk.f32.vlgmr.msra.gmra.mxu0 %vm253_vm0, %v245_v45  ;;  %1166 = vmatprep.subr.mxu0 %v445_v46  ;;  %v619_v45 = vld [vmem:[#allocation7 + $0x218] sm:$0xff] }
 0x110   :  { %1167 = vmatpush3.msra.mxu0 %v445_v46  ;;  %v711_v46 = vld [vmem:[#allocation7 + $0x298] sm:$0xff] }
 0x111   :  { %1168 = vmatprep.subr.mxu0 %v444_v47 }
 0x112   :  { %1169 = vmatpush3.msra.mxu0 %v444_v47  ;;  %v618_v47 = vld [vmem:[#allocation7 + $0x210] sm:$0xff] }
 0x113   :  { %1170 = vmatprep.subr.mxu0 %v443_v48 }
 0x114   :  { %1171 = vmatpush3.msra.mxu0 %v443_v48  ;;  %v710_v48 = vld [vmem:[#allocation7 + $0x290] sm:$0xff] }
 0x115   :  { %1172 = vmatprep.subr.mxu0 %v442_v49 }
 0x116   :  { %1173 = vmatpush3.msra.mxu0 %v442_v49  ;;  %v617_v49 = vld [vmem:[#allocation7 + $0x208] sm:$0xff] }
 0x117   :  { %1174 = vmatprep.subr.mxu0 %v441_v50 }
 0x118   :  { %1175 = vmatpush3.msra.mxu0 %v441_v50  ;;  %v709_v50 = vld [vmem:[#allocation7 + $0x288] sm:$0xff] }
 0x119   :  { %1176 = vmatprep.subr.mxu0 %v440_v51 }
 0x11a   :  { %1177 = vmatpush3.msra.mxu0 %v440_v51  ;;  %v616_v51 = vld [vmem:[#allocation7 + $0x200] sm:$0xff] }
 0x11b   :  { %1178 = vmatprep.subr.mxu0 %v439_v53 }
 0x11c   :  { %1179 = vmatpush3.msra.mxu0 %v439_v53  ;;  %v917_v53 = vld [vmem:[%s1470_s3 + $0x1] ss:$0 sm:$0xff] }
 0x11d   :  { %1180 = vmatprep.subr.mxu0 %v438_v55 }
 0x11e   :  { %1181 = vmatpush3.msra.mxu0 %v438_v55 }
 0x11f   :  { %1182 = vmatprep.subr.mxu0 %v437_v57 }
 0x120   :  { %1183 = vmatpush3.msra.mxu0 %v437_v57 }
 0x121   :  { %1184 = vmatprep.subr.mxu0 %v436_v59 }
 0x122   :  { %1185 = vmatpush3.msra.mxu0 %v436_v59 }
 0x123   :  { %1186 = vmatprep.subr.mxu0 %v435_v61 }
 0x124   :  { %1187 = vmatpush3.msra.mxu0 %v435_v61 }
 0x125   :  { %1188 = vmatprep.subr.mxu0 %v434_v63 }
 0x126   :  { %1189 = vmatpush3.msra.mxu0 %v434_v63 }
 0x127   :  { %1190 = vmatprep.subr.mxu0 %v433_v1 }
 0x128   :  { %1191 = vmatpush3.msra.mxu0 %v433_v1  ;;  %v801_v1 = vld [vmem:[#allocation2 + $0x28] sm:$0xff] }
 0x129   :  { %1192 = vmatprep.subr.mxu0 %v432_v3 }
 0x12a   :  { %1193 = vmatpush3.msra.mxu0 %v432_v3 }
 0x12b   :  { %1194 = vmatprep.subr.mxu0 %v431_v5 }
 0x12c   :  { %1195 = vmatpush3.msra.mxu0 %v431_v5 }
 0x12d   :  { %1196 = vmatprep.subr.mxu0 %v430_v7 }
 0x12e   :  { %1197 = vmatpush3.msra.mxu0 %v430_v7 }
 0x12f   :  { %1212 = vmatprep.subr.mxu0 %v631_v16 }
 0x1cf   :  { %v1130_v9 = vpop.f32.mrf.mxu0 }
 0x1d0   :  { %v332_v10 = vadd.f32 %v1130_v9, %v913_v8 }
 0x1d1   :  { %v326_v11 = vpop.f32.mrf.mxu0 }
 0x1d2   :  { %v327_v12 = vadd.f32 %v913_v8, %v326_v11 }
 0x1d4   :  { %1299 = vtanh.f32 %v327_v12 }
 0x1d5   :  { %1301 = vtanh.f32 %v332_v10 }
 0x1e1   :  { %v1300_v13 = vpop.eup %1299 }
 0x1e2   :  { %v1302_v14 = vpop.eup %1301  ;;  %1163 = vmatprep.mubr.f32.mxu1 %v1300_v13  ;;  %1198 = vmatprep.mubr.f32.mxu0 %v1300_v13 }
 0x1e3   :  { %1164 = vmatmul.mubr.f32.vlgmr.msra.gmra.mxu1 %v1302_v14  ;;  %1199 = vmatmul.mubr.f32.vlgmr.msra.gmra.mxu0 %v1302_v14 }
 0x1e4   :  { %1209 = vmatprep.mubr.msk.f32.mxu1 %vm253_vm0, %v522_v15  ;;  %1213 = vmatpush3.msra.mxu0 %v631_v16 }
 0x1e5   :  { %1214 = vmatprep.subr.mxu0 %v630_v17 }
 0x1e6   :  { %1215 = vmatpush3.msra.mxu0 %v630_v17 }
 0x1e7   :  { %1216 = vmatprep.subr.mxu0 %v629_v18 }
 0x1e8   :  { %1217 = vmatpush3.msra.mxu0 %v629_v18 }
 0x1e9   :  { %1218 = vmatprep.subr.mxu0 %v628_v19 }
 0x1ea   :  { %1219 = vmatpush3.msra.mxu0 %v628_v19 }
 0x1eb   :  { %1220 = vmatprep.subr.mxu0 %v627_v20 }
 0x1ec   :  { %1221 = vmatpush3.msra.mxu0 %v627_v20 }
 0x1ed   :  { %1222 = vmatprep.subr.mxu0 %v626_v21 }
 0x1ee   :  { %1223 = vmatpush3.msra.mxu0 %v626_v21 }
 0x1ef   :  { %1224 = vmatprep.subr.mxu0 %v625_v33 }
 0x1f0   :  { %1225 = vmatpush3.msra.mxu0 %v625_v33 }
 0x1f1   :  { %1226 = vmatprep.subr.mxu0 %v624_v35 }
 0x1f2   :  { %1227 = vmatpush3.msra.mxu0 %v624_v35 }
 0x1f3   :  { %1228 = vmatprep.subr.mxu0 %v623_v37 }
 0x1f4   :  { %1229 = vmatpush3.msra.mxu0 %v623_v37 }
 0x1f5   :  { %1230 = vmatprep.subr.mxu0 %v622_v39 }
 0x1f6   :  { %1231 = vmatpush3.msra.mxu0 %v622_v39 }
 0x1f7   :  { %1232 = vmatprep.subr.mxu0 %v621_v41 }
 0x1f8   :  { %1233 = vmatpush3.msra.mxu0 %v621_v41 }
 0x1f9   :  { %1234 = vmatprep.subr.mxu0 %v620_v43 }
 0x1fa   :  { %1235 = vmatpush3.msra.mxu0 %v620_v43 }
 0x1fb   :  { %1236 = vmatprep.subr.mxu0 %v619_v45 }
 0x1fc   :  { %1237 = vmatpush3.msra.mxu0 %v619_v45 }
 0x1fd   :  { %1238 = vmatprep.subr.mxu0 %v618_v47 }
 0x1fe   :  { %1239 = vmatpush3.msra.mxu0 %v618_v47 }
 0x1ff   :  { %1240 = vmatprep.subr.mxu0 %v617_v49 }
 0x200   :  { %1241 = vmatpush3.msra.mxu0 %v617_v49 }
 0x201   :  { %1242 = vmatprep.subr.mxu0 %v616_v51 }
 0x202   :  { %1243 = vmatpush3.msra.mxu0 %v616_v51 }
 0x2a3   :  { %v1200_v22 = vpop.f32.mrf.mxu0  ;;  %v1165_v23 = vpop.f32.mrf.mxu1 }
 0x2a4   :  { %1201 = vmatprep.subr.mxu1 %v1200_v22 }
 0x2a5   :  { %v512_v24 = vpop.f32.mrf.mxu0  ;;  %1202 = vmatpush3.msra.mxu1 %v1200_v22  ;;  %v420_v25 = vpop.f32.mrf.mxu1 }
 0x2a6   :  { %1203 = vmatprep.subr.mxu1 %v512_v24 }
 0x2a7   :  { %1204 = vmatpush3.msra.mxu1 %v512_v24 }
 0x2a8   :  { %1205 = vmatprep.subr.mxu1 %v1165_v23 }
 0x2a9   :  { %1206 = vmatpush3.msra.mxu1 %v1165_v23 }
 0x2aa   :  { %1207 = vmatprep.subr.mxu1 %v420_v25 }
 0x2ab   :  { %1208 = vmatpush3.msra.mxu1 %v420_v25 }
 0x2ac   :  { %1210 = vmatmul.mubr.msk.f32.vlgmr.msra.gmra.mxu1 %vm253_vm0, %v523_v26  ;;  %1247 = vmatprep.subr.mxu1 %v723_v27 }
 0x2ad   :  { %1248 = vmatpush3.msra.mxu1 %v723_v27 }
 0x2ae   :  { %1249 = vmatprep.subr.mxu1 %v722_v28 }
 0x2af   :  { %1250 = vmatpush3.msra.mxu1 %v722_v28 }
 0x2b0   :  { %1251 = vmatprep.subr.mxu1 %v721_v29 }
 0x2b1   :  { %1252 = vmatpush3.msra.mxu1 %v721_v29 }
 0x2b2   :  { %1253 = vmatprep.subr.mxu1 %v720_v30 }
 0x2b3   :  { %1254 = vmatpush3.msra.mxu1 %v720_v30 }
 0x2b4   :  { %1255 = vmatprep.subr.mxu1 %v719_v31 }
 0x2b5   :  { %1256 = vmatpush3.msra.mxu1 %v719_v31 }
 0x2b6   :  { %1257 = vmatprep.subr.mxu1 %v718_v32 }
 0x2b7   :  { %1258 = vmatpush3.msra.mxu1 %v718_v32 }
 0x2b8   :  { %1259 = vmatprep.subr.mxu1 %v717_v34 }
 0x2b9   :  { %1260 = vmatpush3.msra.mxu1 %v717_v34 }
 0x2ba   :  { %1261 = vmatprep.subr.mxu1 %v716_v36 }
 0x2bb   :  { %1262 = vmatpush3.msra.mxu1 %v716_v36 }
 0x2bc   :  { %1263 = vmatprep.subr.mxu1 %v715_v38 }
 0x2bd   :  { %1264 = vmatpush3.msra.mxu1 %v715_v38 }
 0x2be   :  { %1265 = vmatprep.subr.mxu1 %v714_v40 }
 0x2bf   :  { %1266 = vmatpush3.msra.mxu1 %v714_v40 }
 0x2c0   :  { %1267 = vmatprep.subr.mxu1 %v713_v42 }
 0x2c1   :  { %1268 = vmatpush3.msra.mxu1 %v713_v42 }
 0x2c2   :  { %1269 = vmatprep.subr.mxu1 %v712_v44 }
 0x2c3   :  { %1270 = vmatpush3.msra.mxu1 %v712_v44 }
 0x2c4   :  { %1271 = vmatprep.subr.mxu1 %v711_v46 }
 0x2c5   :  { %1272 = vmatpush3.msra.mxu1 %v711_v46 }
 0x2c6   :  { %1273 = vmatprep.subr.mxu1 %v710_v48 }
 0x2c7   :  { %1274 = vmatpush3.msra.mxu1 %v710_v48 }
 0x2c8   :  { %1275 = vmatprep.subr.mxu1 %v709_v50 }
 0x2c9   :  { %1276 = vmatpush3.msra.mxu1 %v709_v50 }
 0x2ca   :  { %1277 = vmatprep.subr.mxu1 %v708_v52 }
 0x2cb   :  { %1278 = vmatpush3.msra.mxu1 %v708_v52 }
 0x36c   :  { %v1211_v54 = vpop.f32.mrf.mxu1 }
 0x36d   :  { %v610_v55 = vadd.f32 %v1211_v54, %v917_v53 }
 0x36e   :  { %v604_v56 = vpop.f32.mrf.mxu1 }
 0x36f   :  { %v605_v57 = vadd.f32 %v917_v53, %v604_v56 }
 0x371   :  { %1303 = vtanh.f32 %v605_v57 }
 0x372   :  { %1305 = vtanh.f32 %v610_v55 }
 0x37e   :  { %v1304_v58 = vpop.eup %1303 }
 0x37f   :  { %v1306_v59 = vpop.eup %1305  ;;  %1244 = vmatprep.mubr.f32.mxu0 %v1304_v58  ;;  %1279 = vmatprep.mubr.f32.mxu1 %v1304_v58 }
 0x380   :  { %1245 = vmatmul.mubr.f32.vlgmr.msra.gmra.mxu0 %v1306_v59  ;;  %1280 = vmatmul.mubr.f32.vlgmr.msra.gmra.mxu1 %v1306_v59 }
 0x381   :  { %1290 = vmatprep.mubr.msk.f32.mxu0 %vm253_vm0, %v800_v60 }
 0x440   :  { %v1281_v61 = vpop.f32.mrf.mxu1  ;;  %v1246_v62 = vpop.f32.mrf.mxu0 }
 0x441   :  { %1282 = vmatprep.subr.mxu0 %v1281_v61 }
 0x442   :  { %v790_v63 = vpop.f32.mrf.mxu1  ;;  %1283 = vmatpush3.msra.mxu0 %v1281_v61  ;;  %v698_v0 = vpop.f32.mrf.mxu0 }
 0x443   :  { %1284 = vmatprep.subr.mxu0 %v790_v63 }
 0x444   :  { %1285 = vmatpush3.msra.mxu0 %v790_v63 }
 0x445   :  { %1286 = vmatprep.subr.mxu0 %v1246_v62 }
 0x446   :  { %1287 = vmatpush3.msra.mxu0 %v1246_v62 }
 0x447   :  { %1288 = vmatprep.subr.mxu0 %v698_v0 }
 0x448   :  { %1289 = vmatpush3.msra.mxu0 %v698_v0 }
 0x449   :  { %1291 = vmatmul.mubr.msk.f32.vlgmr.msra.gmra.mxu0 %vm253_vm0, %v801_v1 }
 0x509   :  { %v1292_v3 = vpop.f32.mrf.mxu0 }
 0x50a   :  { %v888_v4 = vadd.f32 %v1292_v3, %v921_v2 }
 0x50b   :  { %v882_v5 = vpop.f32.mrf.mxu0 }
 0x50c   :  { %1307 = vtanh.f32 %v888_v4  ;;  %v883_v6 = vadd.f32 %v921_v2, %v882_v5 }
 0x50e   :  { %1309 = vtanh.f32 %v883_v6 }
 0x519   :  { %v1308_v7 = vpop.eup %1307 }
 0x51a   :  { %894 = vst [vmem:[#allocation8 + $0x8] sm:$0xff] %v1308_v7 }
 0x51b   :  { %v1310_v8 = vpop.eup %1309 }
 0x51c   :  { %893 = vst [vmem:[#allocation8] sm:$0xff] %v1310_v8 }
 0x51d   :  { %1382 = shalt.err (!%p1379_p5)
}
 0x51e   :  { %906 = dma.vmem_to_hbm [thread:$0]  %s901_s10, 256, %s1471_s4, [#allocation4], %s1399_s20, %s1399_s20, %s1400_s21  }
 0x51f   :  { %1395 = dma.done.wait [#allocation4], 256  }
 0x520   :  { %1396 = vsyncadd [#allocation4], 4294967040 }
 0x521   :  { %910 = vsyncpa [#allocation3], 1 }
 0x522   :  { %911 = vsyncpa [#allocation6], 1 }
 0x523   :  { %912 = vsyncpa [#allocation4], 1 }

</bundles_post_ra>
